<compile_context>
chip_gen: v7x
topology: tpu7x:2x2x1
jax: 0.10.0
libtpu: 0.0.40
codegen_flags: <defaults>
</compile_context>

<pallas_src>
import functools

import jax
import jax.numpy as jnp
from jax import lax
from jax.experimental import pallas as pl
from jax.experimental.pallas import tpu as pltpu


def _round_up(x, m):
    return ((x + m - 1) // m) * m


def _supcon_kernel(p_rows_ref, p_all_ref, tcol_ref, trow_ref, out_ref, *,
                   inv_temperature, n_valid, numerator_eps):
    # p_rows_ref : (TM, D)     anchor row tile (f32 or bf16)
    # p_all_ref  : (Bp, D)     full (padded) projection matrix, resident
    # tcol_ref   : (TM, 1)     int32 targets of the anchor rows
    # trow_ref   : (1, Bp)     int32 targets of all rows, resident
    # out_ref    : (TM, 1)     f32 per-sample loss
    tm = p_rows_ref.shape[0]
    bp = p_all_ref.shape[0]
    cdt = p_rows_ref.dtype

    # Fold 1/temperature into the small LHS tile (saves a (TM, Bp) VPU multiply).
    lhs = p_rows_ref[...] * jnp.asarray(inv_temperature, dtype=cdt)
    rhs = p_all_ref[...]

    # Gram tile on the MXU, f32 accumulation: (TM, D) x (Bp, D)^T -> (TM, Bp).
    s = lax.dot_general(lhs, rhs, (((1,), (1,)), ((), ())),
                        preferred_element_type=jnp.float32)

    # Row max over real + padded columns.  Padded columns give s == 0, which never
    # exceeds the diagonal (||p_i||^2 / T >= 0), so this equals the reference max.
    row_max = jnp.max(s, axis=1, keepdims=True)
    z = s - row_max
    e = jnp.exp(z)                       # (TM, Bp), EUP
    sim = e + 1e-5                       # PyTorch epsilon

    # keep = not-self AND real (unpadded) column, from a single iota compare.
    row_start = pl.program_id(0) * tm
    row_ids = row_start + lax.broadcasted_iota(jnp.int32, (tm, bp), 0)
    col_ids = lax.broadcasted_iota(jnp.int32, (tm, bp), 1)
    keep = jnp.logical_and(col_ids != row_ids, col_ids < n_valid)
    keep_f = keep.astype(jnp.float32)
    pos_f = jnp.logical_and(tcol_ref[...] == trow_ref[...], keep).astype(jnp.float32)

    denom = jnp.sum(sim * keep_f, axis=1, keepdims=True)   # (TM, 1)
    card = jnp.sum(pos_f, axis=1, keepdims=True)            # (TM, 1)

    # sum_j pos_ij * (-log(sim_ij / denom_i))
    #   = card_i * log(denom_i) - sum_j pos_ij * log(sim_ij)
    if numerator_eps:
        log_sim = jnp.log(sim)           # reference-exact (+1e-5 inside the log)
    else:
        log_sim = z                      # eps only in the denominator: no (TM,Bp) log
    pos_log = jnp.sum(pos_f * log_sim, axis=1, keepdims=True)

    # Exact divide on only TM values (approx reciprocal would cost ~1e-3 accuracy).
    per_sample = jnp.log(denom) - pos_log / jnp.maximum(card, 1.0)
    # Guard anchors with no positive (and padded rows): contribute 0 instead of NaN.
    per_sample = jnp.where(card > 0.0, per_sample, 0.0)
    out_ref[...] = per_sample.astype(jnp.float32)


def supervised_contrastive_loss(projections, targets, temperature=0.07, *,
                                use_bf16_matmul=False, numerator_eps=True,
                                block_rows=128):
    """projections: [B, D] float, targets: [B] int. Returns scalar float32 loss.

    Defaults reproduce the PyTorch module (dot_product similarity).  Set
    use_bf16_matmul=True and/or numerator_eps=False for the faster variants
    (bf16 MXU operands; +1e-5 applied only to the denominator).
    """
    b, d = projections.shape
    compute_dtype = jnp.bfloat16 if use_bf16_matmul else jnp.float32
    proj = projections.astype(compute_dtype)
    t = targets.astype(jnp.int32)

    # Row tile: multiple of 8 sublanes; pad the batch to a whole number of tiles.
    # TM=128 matches the v5e MXU shape and keeps the per-step working set small
    # enough for v7x's 64 MiB VMEM at realistic batch sizes.
    tm = _round_up(min(block_rows, b), 8)
    b_pad = _round_up(b, tm)
    if b_pad != b:
        proj = jnp.pad(proj, ((0, b_pad - b), (0, 0)))
        t = jnp.pad(t, (0, b_pad - b))
    tcol = t.reshape(b_pad, 1)
    trow = t.reshape(1, b_pad)

    kernel = functools.partial(
        _supcon_kernel,
        inv_temperature=1.0 / float(temperature),
        n_valid=b,
        numerator_eps=numerator_eps,
    )

    # Rough VMEM budget (resident full P, double-buffered row tiles, ~6 (TM,Bp)
    # f32 temporaries); clip to [32 MiB, 100 MiB] so moderate batches don't trip
    # the small default scoped-VMEM limits on v5e/v6e.
    itemsize = jnp.dtype(compute_dtype).itemsize
    need = b_pad * d * itemsize + 2 * tm * d * itemsize + 6 * tm * b_pad * 4 + (1 << 20)
    vmem_limit = int(min(max(2 * need, 32 * 1024 * 1024), 100 * 1024 * 1024))

    out = pl.pallas_call(
        kernel,
        out_shape=jax.ShapeDtypeStruct((b_pad, 1), jnp.float32),
        grid=(b_pad // tm,),
        in_specs=[
            pl.BlockSpec((tm, d), lambda i: (i, 0)),       # anchor row tile
            pl.BlockSpec((b_pad, d), lambda i: (0, 0)),    # all rows (resident)
            pl.BlockSpec((tm, 1), lambda i: (i, 0)),       # anchor targets (column)
            pl.BlockSpec((1, b_pad), lambda i: (0, 0)),    # all targets (row, resident)
        ],
        out_specs=pl.BlockSpec((tm, 1), lambda i: (i, 0)),
        compiler_params=pltpu.CompilerParams(
            dimension_semantics=("parallel",),
            vmem_limit_bytes=vmem_limit,
        ),
    )(proj, proj, tcol, trow)

    return jnp.mean(out[:b, 0])


def _reference_loss(projections, targets, temperature=0.07):
    """Plain-JAX reference mirroring the PyTorch forward (dot_product branch)."""
    p = projections.astype(jnp.float32)
    dot = (p @ p.T) / temperature
    sim = jnp.exp(dot - jnp.max(dot, axis=1, keepdims=True)) + 1e-5
    mask_similar = (targets[:, None] == targets[None, :]).astype(jnp.float32)
    mask_anchor_out = 1.0 - jnp.eye(p.shape[0], dtype=jnp.float32)
    mask_combined = mask_similar * mask_anchor_out
    card = jnp.sum(mask_combined, axis=1)
    log_prob = -jnp.log(sim / jnp.sum(sim * mask_anchor_out, axis=1, keepdims=True))
    per_sample = jnp.sum(log_prob * mask_combined, axis=1) / card
    return jnp.mean(per_sample)


def _reference_loss_fast(projections, targets, temperature=0.07):
    """Reference for the fast variant: bf16 matmul operands, eps only in denominator."""
    pb = projections.astype(jnp.bfloat16)
    lhs = (pb * jnp.asarray(1.0 / temperature, jnp.bfloat16)).astype(jnp.float32)
    dot = lhs @ pb.astype(jnp.float32).T
    z = dot - jnp.max(dot, axis=1, keepdims=True)
    e = jnp.exp(z)
    not_self = 1.0 - jnp.eye(pb.shape[0], dtype=jnp.float32)
    mask_pos = (targets[:, None] == targets[None, :]).astype(jnp.float32) * not_self
    denom = jnp.sum((e + 1e-5) * not_self, axis=1)
    card = jnp.sum(mask_pos, axis=1)
    per_sample = jnp.log(denom) - jnp.sum(mask_pos * z, axis=1) / card
    return jnp.mean(per_sample)


if __name__ == "__main__":
    B, D = 8, 32
    key = jax.random.PRNGKey(0)
    kp, kt = jax.random.split(key)
    projections = jax.random.normal(kp, (B, D), dtype=jnp.float32)
    # Ensure every sample has at least one positive (duplicate the label block).
    targets = jax.random.randint(kt, (B // 2,), 0, 2, dtype=jnp.int32)
    targets = jnp.concatenate([targets, targets], axis=0)

    # Default mode: reference-exact PyTorch semantics.
    loss = supervised_contrastive_loss(projections, targets, temperature=0.07)
    loss = jax.block_until_ready(loss)
    ref = _reference_loss(projections, targets, temperature=0.07)
    assert jnp.allclose(loss, ref, rtol=1e-4, atol=1e-4), (loss, ref)

    # Fast mode from the perf review: bf16 MXU operands, no (B,B) log.
    loss_fast = supervised_contrastive_loss(
        projections, targets, temperature=0.07,
        use_bf16_matmul=True, numerator_eps=False)
    loss_fast = jax.block_until_ready(loss_fast)
    ref_fast = _reference_loss_fast(projections, targets, temperature=0.07)
    assert jnp.allclose(loss_fast, ref_fast, rtol=1e-3, atol=1e-2), (loss_fast, ref_fast)

    print("KERNEL_OK")
</pallas_src>

<mosaic_0001>
module attributes {stable_mosaic.version = 11 : i64} {
  func.func @_supcon_kernel(%arg0: i32, %arg1: memref<8x32xf32, #tpu.memory_space<vmem>>, %arg2: memref<8x32xf32, #tpu.memory_space<vmem>>, %arg3: memref<8x1xi32, #tpu.memory_space<vmem>>, %arg4: memref<1x8xi32, #tpu.memory_space<vmem>>, %arg5: memref<8x1xf32, #tpu.memory_space<vmem>>) attributes {dimension_semantics = [#tpu.dimension_semantics<parallel>], iteration_bounds = array<i64: 1>, scalar_prefetch = 0 : i64, scratch_operands = 0 : i64, tpu.core_type = #tpu.core_type<tc>, window_params = [{transform_indices = @transform_0, window_bounds = array<i64: 8, 32>}, {pipeline_mode = #tpu.pipeline_mode<synchronous>, transform_indices = @transform_1, window_bounds = array<i64: 8, 32>}, {transform_indices = @transform_2, window_bounds = array<i64: 8, 1>}, {pipeline_mode = #tpu.pipeline_mode<synchronous>, transform_indices = @transform_3, window_bounds = array<i64: 1, 8>}, {transform_indices = @transform_4, window_bounds = array<i64: 8, 1>}]} {
    %c0 = arith.constant 0 : index
    %c0_0 = arith.constant 0 : index
    %0 = vector.load %arg1[%c0, %c0_0] : memref<8x32xf32, #tpu.memory_space<vmem>>, vector<8x32xf32>
    %cst = arith.constant 14.2857141 : f32
    %1 = vector.broadcast %cst : f32 to vector<8x32xf32>
    %2 = arith.mulf %0, %1 : vector<8x32xf32>
    %c0_1 = arith.constant 0 : index
    %c0_2 = arith.constant 0 : index
    %3 = vector.load %arg2[%c0_1, %c0_2] : memref<8x32xf32, #tpu.memory_space<vmem>>, vector<8x32xf32>
    %cst_3 = arith.constant dense<0.000000e+00> : vector<8x8xf32>
    %4 = tpu.matmul %2, %3, %cst_3 {dimension_numbers = #tpu.dot_dimension_numbers<[1], [1], [0], [0], [0, 0, 1, 0], [], []>} : vector<8x32xf32>, vector<8x32xf32>, vector<8x8xf32> -> vector<8x8xf32>
    %cst_4 = arith.constant dense<0xFF800000> : vector<8xf32>
    %5 = vector.multi_reduction <maximumf>, %4, %cst_4 [1] : vector<8x8xf32> to vector<8xf32>
    %6 = vector.shape_cast %5 : vector<8xf32> to vector<8x1xf32>
    %7 = vector.broadcast %6 : vector<8x1xf32> to vector<8x8xf32>
    %8 = arith.subf %4, %7 : vector<8x8xf32>
    %9 = math.exp %8 : vector<8x8xf32>
    %cst_5 = arith.constant 9.99999974E-6 : f32
    %10 = vector.broadcast %cst_5 : f32 to vector<8x8xf32>
    %11 = arith.addf %9, %10 : vector<8x8xf32>
    %c8_i32 = arith.constant 8 : i32
    %12 = arith.muli %arg0, %c8_i32 : i32
    %13 = tpu.iota {dimensions = array<i32: 0>} : vector<8x8xi32>
    %14 = vector.broadcast %12 : i32 to vector<8x8xi32>
    %15 = arith.addi %14, %13 : vector<8x8xi32>
    %16 = tpu.iota {dimensions = array<i32: 1>} : vector<8x8xi32>
    %17 = arith.cmpi ne, %16, %15 : vector<8x8xi32>
    %c8_i32_6 = arith.constant 8 : i32
    %18 = vector.broadcast %c8_i32_6 : i32 to vector<8x8xi32>
    %19 = arith.cmpi slt, %16, %18 : vector<8x8xi32>
    %20 = arith.andi %17, %19 : vector<8x8xi1>
    %21 = arith.extui %20 : vector<8x8xi1> to vector<8x8xi32>
    %22 = arith.sitofp %21 : vector<8x8xi32> to vector<8x8xf32>
    %c0_7 = arith.constant 0 : index
    %c0_8 = arith.constant 0 : index
    %23 = vector.load %arg3[%c0_7, %c0_8] : memref<8x1xi32, #tpu.memory_space<vmem>>, vector<8x1xi32>
    %c0_9 = arith.constant 0 : index
    %c0_10 = arith.constant 0 : index
    %24 = vector.load %arg4[%c0_9, %c0_10] : memref<1x8xi32, #tpu.memory_space<vmem>>, vector<1x8xi32>
    %25 = vector.broadcast %23 : vector<8x1xi32> to vector<8x8xi32>
    %26 = vector.broadcast %24 : vector<1x8xi32> to vector<8x8xi32>
    %27 = arith.cmpi eq, %25, %26 : vector<8x8xi32>
    %28 = arith.andi %27, %20 : vector<8x8xi1>
    %29 = arith.extui %28 : vector<8x8xi1> to vector<8x8xi32>
    %30 = arith.sitofp %29 : vector<8x8xi32> to vector<8x8xf32>
    %31 = arith.mulf %11, %22 : vector<8x8xf32>
    %cst_11 = arith.constant dense<0.000000e+00> : vector<8xf32>
    %32 = vector.multi_reduction <add>, %31, %cst_11 [1] : vector<8x8xf32> to vector<8xf32>
    %33 = vector.shape_cast %32 : vector<8xf32> to vector<8x1xf32>
    %cst_12 = arith.constant dense<0.000000e+00> : vector<8xf32>
    %34 = vector.multi_reduction <add>, %30, %cst_12 [1] : vector<8x8xf32> to vector<8xf32>
    %35 = vector.shape_cast %34 : vector<8xf32> to vector<8x1xf32>
    %36 = math.log %11 : vector<8x8xf32>
    %37 = arith.mulf %30, %36 : vector<8x8xf32>
    %cst_13 = arith.constant dense<0.000000e+00> : vector<8xf32>
    %38 = vector.multi_reduction <add>, %37, %cst_13 [1] : vector<8x8xf32> to vector<8xf32>
    %39 = vector.shape_cast %38 : vector<8xf32> to vector<8x1xf32>
    %40 = math.log %33 : vector<8x1xf32>
    %cst_14 = arith.constant 1.000000e+00 : f32
    %41 = vector.broadcast %cst_14 : f32 to vector<8x1xf32>
    %42 = arith.maximumf %35, %41 : vector<8x1xf32>
    %43 = arith.divf %39, %42 : vector<8x1xf32>
    %44 = arith.subf %40, %43 : vector<8x1xf32>
    %cst_15 = arith.constant 0.000000e+00 : f32
    %45 = vector.broadcast %cst_15 : f32 to vector<8x1xf32>
    %46 = arith.cmpf ogt, %35, %45 : vector<8x1xf32>
    %cst_16 = arith.constant 0.000000e+00 : f32
    %47 = vector.broadcast %cst_16 : f32 to vector<8x1xf32>
    %48 = arith.select %46, %44, %47 : vector<8x1xi1>, vector<8x1xf32>
    %c0_17 = arith.constant 0 : index
    %c0_18 = arith.constant 0 : index
    %49 = vector.load %arg5[%c0_17, %c0_18] : memref<8x1xf32, #tpu.memory_space<vmem>>, vector<8x1xf32>
    tpu.vector_store %arg5[%c0_17, %c0_18], %48 {strides = array<i32>} : memref<8x1xf32, #tpu.memory_space<vmem>>, vector<8x1xf32>,
    return
  }
  func.func @transform_0(%arg0: i32) -> (i32, i32) {
    %c0_i32 = arith.constant 0 : i32
    %c0_i32_0 = arith.constant 0 : i32
    return %arg0, %c0_i32 : i32, i32
  }
  func.func @transform_1(%arg0: i32) -> (i32, i32) {
    %c0_i32 = arith.constant 0 : i32
    %c0_i32_0 = arith.constant 0 : i32
    %c0_i32_1 = arith.constant 0 : i32
    return %c0_i32, %c0_i32_0 : i32, i32
  }
  func.func @transform_2(%arg0: i32) -> (i32, i32) {
    %c0_i32 = arith.constant 0 : i32
    %c0_i32_0 = arith.constant 0 : i32
    return %arg0, %c0_i32 : i32, i32
  }
  func.func @transform_3(%arg0: i32) -> (i32, i32) {
    %c0_i32 = arith.constant 0 : i32
    %c0_i32_0 = arith.constant 0 : i32
    %c0_i32_1 = arith.constant 0 : i32
    return %c0_i32, %c0_i32_0 : i32, i32
  }
  func.func @transform_4(%arg0: i32) -> (i32, i32) {
    %c0_i32 = arith.constant 0 : i32
    %c0_i32_0 = arith.constant 0 : i32
    return %arg0, %c0_i32 : i32, i32
  }
}

</mosaic_0001>

<bundles_post_ra>
// kernel: tpu_custom_call.1
= control target key start
LH: loop header
LB: loop body
LE: loop exit
PB: predicated region body
PF: predicated region fallthrough
CT: control target
= control target key end

     0   :  { %9 = vsyncpa [#allocation3], 0  ;;  %s219_s15 = smov [#allocation2]   ;;  %s276_s0 = inlined_call_operand.vmem [shape: f32[8,32], index: 0, kind: input, shape index: {}]   ;;  %s277_s1 = inlined_call_operand.hbm [shape: f32[8,32], index: 1, kind: input, shape index: {}]   ;;  %s278_s2 = inlined_call_operand.vmem [shape: s32[8,1], index: 2, kind: input, shape index: {}]   ;;  %s279_s3 = inlined_call_operand.vmem [shape: s32[1,8], index: 3, kind: input, shape index: {}]   ;;  %s280_s4 = inlined_call_operand.vmem [shape: f32[8,1], index: 4, kind: output, shape index: {}]  }
   0x1   :  { %s18_s16 = sshll.u32 %s219_s15, 4  ;;  %s195_s19 = scalar_lea.hbm %s277_s1, 128  ;;  %s19_s16 = int_to_ptr.vmem [resolvable:$true] %s18_s16 }
   0x2   :  { %p196_p0 = scmp.ne.s32.totalorder %s277_s1, %s195_s19  ;;  %p199_p1 = scmp.lt.u32.totalorder %s195_s19, %s277_s1 }
   0x4   :  { %p201_p2 = pnand %p199_p1, %p196_p0 }
   0x6   :  { %204 = shalt.err (!%p201_p2)
}
   0x7   :  { %s205_s24 = scalar_lea.vmem %s19_s16, 128  ;;  %p210_p4 = scmp.lt.s32.totalorder %s19_s16, %s19_s16 }
   0x8   :  { %p206_p3 = scmp.ne.s32.totalorder %s19_s16, %s205_s24  ;;  %p211_p5 = scmp.lt.s32.totalorder %s205_s24, %s205_s24 }
   0xa   :  { %p212_p6 = por %p211_p5, %p210_p4 }
   0xc   :  { %p213_p7 = pnand %p212_p6, %p206_p3 }
   0xe   :  { %216 = shalt.err (!%p213_p7)
}
   0xf   :  { %21 = dma.hbm_to_vmem [thread:$0]  %s277_s1, 128, %s19_s16, [#allocation3]  }
  0x10   :  { %217 = dma.done.wait [#allocation3], 128  }
  0x11   :  { %218 = vsyncadd [#allocation3], 4294967168  ;;  %v220_v0 = vmov 0.0   ;;  %vm221_vm0 = vmmov 0   ;;  %vm32_vm1 = vcmask 261120   ;;  %v31_v1 = vld [vmem:[#allocation2] sm:$0xff]  ;;  %v118_v9 = vlaneseq }
  0x12   :  { %177 = vmatprep.subr.mxu0 %v220_v0  ;;  %179 = vmatprep.mubr.msk.f32.mxu0 %vm221_vm0, %v220_v0  ;;  %v29_v2 = vld [vmem:[%s276_s0] sm:$0xff]  ;;  %v222_v4 = vmov 0   ;;  %vm109_vm2 = vcmask 64512   ;;  %vm163_vm8 = vcmask 7168  }
  0x13   :  { %178 = vmatpush3.xpose.msk.msra.mxu0 %vm32_vm1, %v31_v1  ;;  %v30_v3 = vmul.f32 14.285714, %v29_v2  ;;  %186 = vset.pattern.permute.xlu0 %v222_v4  ;;  %v129_v8 = vld [vmem:[%s278_s2] sm:$0xff]  ;;  %v119_v11 = vshrl.u32 %v118_v9, 7  ;;  %v123_v12 = vand.u32 127, %v118_v9 }
  0x14   :  { %v173_v15 = vld [vmem:[%s279_s3] ss:$0 sm:$0xff] }
  0x15   :  { %vm124_vm3 = vcmp.ne.s32.totalorder %v123_v12, %v119_v11  ;;  %vm125_vm4 = vcmp.lt.s32.totalorder %v123_v12, 8 }
  0x16   :  { %180 = vmatmul.mubr.msk.f32.vlgmr.msra.gmra.mrb[0].mxu0 %vm32_vm1, %v30_v3  ;;  %vm126_vm5 = vmand %vm124_vm3, %vm125_vm4 }
  0x17   :  { %v172_v20 = vsel %vm126_vm5, 1.0, %v220_v0 }
  0xe9   :  { %v105_v5 = vpop.f32.mrb[0].mxu0 }
  0xea   :  { %v181_v6 = vpop.f32.mrb[1].mxu0  ;;  %v110_v7 = vsel %vm109_vm2, %v105_v5, -inf }
  0xeb   :  { %111 = vmax.xlane.f32.xlu0 %v110_v7 }
 0x101   :  { %132 = vperm.xlu0 %186, %v129_v8  }
 0x178   :  { %v112_v10 = vpop.xlane.xlu0 %111 }
 0x179   :  { %v113_v13 = vsub.f32 %v105_v5, %v112_v10 }
 0x17b   :  { %v114_v14 = vmul.f32 1.442695, %v113_v13 }
 0x17d   :  { %187 = vpow2.f32 %v114_v14 }
 0x180   :  { %v133_v16 = vpop.permute.xlu0 %132 }
 0x181   :  { %vm138_vm6 = vcmp.eq.s32.totalorder %v133_v16, %v173_v15 }
 0x182   :  { %vm139_vm7 = vmand %vm138_vm6, %vm126_vm5 }
 0x183   :  { %v174_v17 = vsel %vm139_vm7, 1.0, %v220_v0 }
 0x184   :  { %v146_v18 = vsel %vm109_vm2, %v174_v17, 0.0 }
 0x185   :  { %147 = vadd.xlane.f32.xlu1 %v146_v18 }
 0x187   :  { %v188_v19 = vpop.eup %187 }
 0x188   :  { %v116_v21 = vadd.f32 1e-05, %v188_v19 }
 0x18a   :  { %189 = vlog2.f32 %v116_v21  ;;  %v142_v22 = vmul.f32 %v172_v20, %v116_v21 }
 0x18c   :  { %v143_v23 = vsel %vm109_vm2, %v142_v22, 0.0 }
 0x18d   :  { %144 = vadd.xlane.f32.xlu1 %v143_v23 }
 0x194   :  { %v190_v24 = vpop.eup %189 }
 0x195   :  { %v150_v25 = vmul.f32 0.6931472, %v190_v24 }
 0x197   :  { %v151_v26 = vmul.f32 %v174_v17, %v150_v25 }
 0x199   :  { %v152_v27 = vsel %vm109_vm2, %v151_v26, 0.0 }
 0x19a   :  { %153 = vadd.xlane.f32.xlu1 %v152_v27 }
 0x212   :  { %v148_v28 = vpop.xlane.xlu1 %147 }
 0x213   :  { %v157_v29 = vmax.f32 %v148_v28, 1.0  ;;  %vm161_vm9 = vcmp.gt.f32.partialorder %v148_v28, 0.0 }
 0x21a   :  { %v145_v30 = vpop.xlane.xlu1 %144 }
 0x21b   :  { %191 = vlog2.f32 %v145_v30 }
 0x21c   :  { %193 = vrcp.f32 %v157_v29 }
 0x225   :  { %v192_v31 = vpop.eup %191 }
 0x226   :  { %v194_v32 = vpop.eup %193  ;;  %v156_v34 = vmul.f32 0.6931472, %v192_v31 }
 0x227   :  { %v154_v33 = vpop.xlane.xlu1 %153 }
 0x228   :  { %v159_v35 = vmul.f32 %v194_v32, %v154_v33 }
 0x22a   :  { %v160_v36 = vsub.f32 %v156_v34, %v159_v35 }
 0x22c   :  { %v162_v37 = vsel %vm161_vm9, %v160_v36, 0.0 }
 0x22d   :  { %164 = vst.msk [vmem:[%s280_s4] sm:$0xff] %vm163_vm8, %v162_v37 }
 0x22e   :  { %169 = vsyncpa [#allocation3], 1 }

</bundles_post_ra>
